<compile_context>
chip_gen: v6e
topology: v6e:2x2x1
jax: 0.10.0
libtpu: 0.0.40
codegen_flags: <defaults>
</compile_context>

<pallas_src>
import math
import functools

import jax
import jax.numpy as jnp
from jax import lax
from jax.experimental import pallas as pl
from jax.experimental.pallas import tpu as pltpu

_LANE = 128
_SEQ_GRAIN = 16      # sublane-pack-safe tile granularity (covers bf16's (16,128))


def _round_up(n, m):
    return (n + m - 1) // m * m


def _vmem_limit_bytes():
    mib = 1024 * 1024
    try:
        cap = getattr(pltpu.get_tpu_info(), "vmem_capacity_bytes", None)
    except Exception:
        cap = None
    if cap is None:
        return 48 * mib                      # safe everywhere (incl. v7x)
    return 64 * mib if cap >= 100 * mib else 48 * mib   # v5e/v6e : v7x


# ----------------------------- Pallas kernel --------------------------------
def _prefix_attn_kernel(qi_tab_ref, kb_tab_ref, q_ref, k_ref, v_ref, o_ref,
                        acc_ref, *, ne, ones_col, inv_rd, inv_2rd2, eps):
    """One grid step = one (batch, head, scheduled (q-tile, kv-block)) pair.

    q_ref : (TQ, F)        k_ref : (TKV, F)       v_ref : (TKV, Dhp)
    o_ref : (TQ, Dhp)      acc_ref : f32 (TQ, Dhp) persistent accumulator.
    kv block kb < ne        -> prefix block (always visible, unmasked)
    kv block kb == ne + qi  -> diagonal decoder block (mask + finalize)
    """
    step = pl.program_id(2)
    qi = qi_tab_ref[step]
    kb = kb_tab_ref[step]
    is_diag = kb == ne + qi                 # last kv step for this q tile

    @pl.when(kb == 0)                       # first kv step for this q tile
    def _init():
        acc_ref[...] = jnp.zeros_like(acc_ref)

    q = q_ref[...]
    k = k_ref[...]
    v = v_ref[...]

    # scores: contract feature dims directly (NT matmul, no transposed copy)
    s = lax.dot_general(q, k, (((1,), (1,)), ((), ())),
                        preferred_element_type=jnp.float32)          # (TQ, TKV)
    a = 1.0 + s * (inv_rd + s * inv_2rd2)                            # Horner poly

    @pl.when(jnp.logical_not(is_diag))
    def _off_diag():                         # prefix or fully-visible decoder block
        acc_ref[...] += jnp.dot(a.astype(v.dtype), v,
                                preferred_element_type=jnp.float32)

    @pl.when(is_diag)
    def _diag_and_finalize():                # diagonal block: mask, then finalize
        row = lax.broadcasted_iota(jnp.int32, a.shape, 0)
        col = lax.broadcasted_iota(jnp.int32, a.shape, 1)
        am = jnp.where(col <= row, a, 0.0)
        acc = acc_ref[...] + jnp.dot(am.astype(v.dtype), v,
                                     preferred_element_type=jnp.float32)
        den = acc[:, ones_col:ones_col + 1] + eps    # normalizer = "ones" column
        z = pl.reciprocal(den, approx=True)          # EUP slot, off the VALU
        o_ref[...] = (acc * z).astype(o_ref.dtype)


def _prefix_attn_pallas(q, k, v, *, dhp, tq, tkv, ne, nq, ones_col, rd, eps,
                        out_dtype):
    """q: (B,H,Sp,F)   k: (B,H,Sep+Sp,F)   v: (B,H,Sep+Sp,Dhp) -> (B,H,Sp,Dhp)."""
    B, H, Sp, F = q.shape

    # Flattened schedule over (q-tile, kv-block): prefix blocks + causal blocks
    # only -> no empty grid steps, finalize happens on the diagonal block.
    sched = [(qi, kb) for qi in range(nq) for kb in range(ne + qi + 1)]
    qi_tab = jnp.asarray([p[0] for p in sched], dtype=jnp.int32)
    kb_tab = jnp.asarray([p[1] for p in sched], dtype=jnp.int32)
    n_steps = len(sched)

    kernel = functools.partial(
        _prefix_attn_kernel, ne=ne, ones_col=ones_col,
        inv_rd=1.0 / rd, inv_2rd2=1.0 / (2.0 * rd * rd), eps=eps)

    q_map = lambda b, h, s, qt, kt: (b, h, qt[s], 0)
    kv_map = lambda b, h, s, qt, kt: (b, h, kt[s], 0)

    return pl.pallas_call(
        kernel,
        out_shape=jax.ShapeDtypeStruct((B, H, Sp, dhp), out_dtype),
        grid_spec=pltpu.PrefetchScalarGridSpec(
            num_scalar_prefetch=2,
            grid=(B, H, n_steps),
            in_specs=[
                pl.BlockSpec((None, None, tq, F), q_map),      # q  (compact F)
                pl.BlockSpec((None, None, tkv, F), kv_map),    # k  (compact F)
                pl.BlockSpec((None, None, tkv, dhp), kv_map),  # v  (lane-dense)
            ],
            out_specs=pl.BlockSpec((None, None, tq, dhp), q_map),
            scratch_shapes=[pltpu.VMEM((tq, dhp), jnp.float32)],
        ),
        compiler_params=pltpu.CompilerParams(
            dimension_semantics=("parallel", "parallel", "arbitrary"),
            vmem_limit_bytes=_vmem_limit_bytes(),
        ),
    )(qi_tab, kb_tab, q, k, v)


# --------------------------- weight lane-padding ------------------------------
def _pad_head_rows(w, num_heads, d, dp):
    """(H*d, E) -> (H*dp, E): zero-pad each head's output rows (exact math)."""
    if dp == d:
        return w
    e = w.shape[1]
    return jnp.pad(w.reshape(num_heads, d, e),
                   ((0, 0), (0, dp - d), (0, 0))).reshape(num_heads * dp, e)


def _pad_head_cols(w, num_heads, d, dp):
    """(E, H*d) -> (E, H*dp): zero-pad each head's input columns (exact math)."""
    if dp == d:
        return w
    e = w.shape[0]
    return jnp.pad(w.reshape(e, num_heads, d),
                   ((0, 0), (0, 0), (0, dp - d))).reshape(e, num_heads * dp)


# ------------------------------ Module wrapper -------------------------------
def init_params(key, embed_dim, num_heads, feature_dim, dtype=jnp.float32):
    """Deterministic nn.Linear-style weights (out_features, in_features), no bias."""
    head_dim = embed_dim // num_heads

    def linear_w(k, out_f, in_f):
        bound = 1.0 / math.sqrt(in_f)
        return jax.random.uniform(k, (out_f, in_f), dtype, -bound, bound)

    ks = jax.random.split(key, 6)
    return {
        "wq":     linear_w(ks[0], feature_dim * num_heads, embed_dim),
        "wk":     linear_w(ks[1], feature_dim * num_heads, embed_dim),
        "wv":     linear_w(ks[2], num_heads * head_dim, embed_dim),
        "wk_enc": linear_w(ks[3], feature_dim * num_heads, embed_dim),
        "wv_enc": linear_w(ks[4], num_heads * head_dim, embed_dim),
        "wo":     linear_w(ks[5], embed_dim, num_heads * head_dim),
    }


def prefix_linear_attention(x, params, *, num_heads, feature_dim, enc_length,
                            eps=1e-12, scale_dim=None, tile=512,
                            mxu_dtype=jnp.bfloat16):
    """Forward pass of PrefixLinearAttention (implementation='default', no cache)."""
    # TODO(synk): recurrent_forward / KV-state inference-cache path and the
    #             'fla_parallel' implementation branch are not implemented.
    B, S, E = x.shape
    H, F = num_heads, feature_dim
    Dh = E // H
    rd = math.sqrt(F if scale_dim is None else scale_dim)
    cdt = x.dtype if mxu_dtype is None else mxu_dtype

    # Geometry: q/k keep the compact feature dim F in HBM; v/out are lane-padded
    # per head (Dh -> Dhp, with one spare column used as the normalizer column).
    Dhp = _round_up(Dh + 1, _LANE)
    TQ = TKV = min(tile, _round_up(S, _SEQ_GRAIN))
    Sp = _round_up(S, TQ)
    Se = min(enc_length, S)
    Sep = _round_up(Se, TKV)
    nq, ne = Sp // TQ, Sep // TKV

    xp = x if Sp == S else jnp.pad(x, ((0, 0), (0, Sp - S), (0, 0)))
    x_enc = x[:, :Se]

    # ---- q / k projections, head-major (B,H,L,F): contiguous per-head DMA ----
    def qk_proj(xx, w, L):
        return (xx @ w.T).reshape(B, L, H, F).transpose(0, 2, 1, 3)

    q = qk_proj(xp, params["wq"], Sp).astype(cdt)                   # (B,H,Sp,F)
    k_dec = qk_proj(xp, params["wk"], Sp)
    k_enc = qk_proj(x_enc, params["wk_enc"], Se)
    if Sep != Se:
        k_enc = jnp.pad(k_enc, ((0, 0), (0, 0), (0, Sep - Se), (0, 0)))
    k = jnp.concatenate([k_enc, k_dec], axis=2).astype(cdt)         # (B,H,Sep+Sp,F)

    # ---- v projections, head-major lane-padded, with "ones" normalizer col ----
    wv = _pad_head_rows(params["wv"], H, Dh, Dhp)
    wv_enc = _pad_head_rows(params["wv_enc"], H, Dh, Dhp)
    wo = _pad_head_cols(params["wo"], H, Dh, Dhp)

    def v_proj(xx, w, L):
        return (xx @ w.T).reshape(B, L, H, Dhp).transpose(0, 2, 1, 3)

    def with_ones_col(v_, real_len):
        # column Dh of every head := 1.0 for real rows only; padded rows stay
        # all-zero so they contribute nothing to numerator or denominator.
        L = v_.shape[2]
        row_ok = (jnp.arange(L) < real_len).astype(v_.dtype)
        col_ok = (jnp.arange(Dhp) == Dh).astype(v_.dtype)
        return v_ + row_ok[None, None, :, None] * col_ok[None, None, None, :]

    v_dec = with_ones_col(v_proj(xp, wv, Sp), S)                    # (B,H,Sp,Dhp)
    v_enc = v_proj(x_enc, wv_enc, Se)
    if Sep != Se:
        v_enc = jnp.pad(v_enc, ((0, 0), (0, 0), (0, Sep - Se), (0, 0)))
    v_enc = with_ones_col(v_enc, Se)
    v = jnp.concatenate([v_enc, v_dec], axis=2).astype(cdt)         # (B,H,Sep+Sp,Dhp)

    # ---- hot path ----
    y = _prefix_attn_pallas(q, k, v, dhp=Dhp, tq=TQ, tkv=TKV, ne=ne, nq=nq,
                            ones_col=Dh, rd=rd, eps=eps, out_dtype=cdt)
    y = y[:, :, :S]                                                 # (B,H,S,Dhp)

    # Output projection; padded head columns (incl. the normalizer column) of y
    # hit zero columns of the padded wo, so no un-padding slice is needed.
    out = jnp.einsum('bhsd,ehd->bse', y, wo.reshape(E, H, Dhp))
    return out.astype(x.dtype)


# --------------------------- Pure-JAX reference ------------------------------
def _taylor_exp(x, rd):
    r2 = math.sqrt(2.0)
    rrd = math.sqrt(rd)
    x2 = (x[..., :, None] * x[..., None, :]).reshape(*x.shape[:-1], -1) / r2
    return jnp.concatenate([jnp.ones_like(x[..., :1]), x / rrd, x2 / rd], axis=-1)


def reference_forward(x, params, *, num_heads, feature_dim, enc_length,
                      eps=1e-12, scale_dim=None):
    B, S, E = x.shape
    H, F, Dh = num_heads, feature_dim, E // num_heads
    rd = math.sqrt(F if scale_dim is None else scale_dim)

    def proj(w, last_dim, xx, L):
        return (xx @ w.T).reshape(B, L, H, last_dim).transpose(0, 2, 1, 3)

    q = proj(params["wq"], F, x, S)
    k = proj(params["wk"], F, x, S)
    v = proj(params["wv"], Dh, x, S)
    Se = min(enc_length, S)
    x_enc = x[:, :Se]
    k_enc = proj(params["wk_enc"], F, x_enc, Se)
    v_enc = proj(params["wv_enc"], Dh, x_enc, Se)

    k_enc_f = _taylor_exp(k_enc, rd)
    qf, kf = _taylor_exp(q, rd), _taylor_exp(k, rd)
    A = jnp.einsum("bhnd,bhmd->bhnm", qf, kf)
    A = jnp.tril(A)
    y1 = jnp.einsum("bhnm,bhme->bhne", A, v)
    A2 = jnp.einsum("bhnd,bhmd->bhnm", qf, k_enc_f)
    y2 = jnp.einsum("bhnm,bhme->bhne", A2, v_enc)
    k_state = k_enc_f.sum(axis=2, keepdims=True) + jnp.cumsum(kf, axis=2)
    z = 1.0 / ((qf * k_state).sum(axis=-1) + eps)
    out = ((y1 + y2) * z[..., None]).transpose(0, 2, 1, 3).reshape(B, S, H * Dh)
    return out @ params["wo"].T


# ---------------------------------- main -------------------------------------
if __name__ == "__main__":
    B, S, E = 2, 8, 32
    num_heads = 2
    feature_dim = 8
    enc_length = 4

    key = jax.random.PRNGKey(0)
    kp, kx = jax.random.split(key)
    params = init_params(kp, E, num_heads, feature_dim)
    x = jax.random.normal(kx, (B, S, E), dtype=jnp.float32)

    out = prefix_linear_attention(
        x, params, num_heads=num_heads, feature_dim=feature_dim,
        enc_length=enc_length)
    out = jax.block_until_ready(out)

    ref = reference_forward(
        x, params, num_heads=num_heads, feature_dim=feature_dim,
        enc_length=enc_length)

    assert out.shape == (B, S, E), out.shape
    # bf16 MXU operands / bf16 kernel output (f32 accumulation) -> bf16 tolerance.
    max_err = float(jnp.max(jnp.abs(out - ref)))
    assert jnp.allclose(out, ref, rtol=2e-2, atol=2e-2), max_err
    print("KERNEL_OK")
</pallas_src>

<mosaic_0001>
module attributes {stable_mosaic.version = 11 : i64} {
  func.func @_prefix_attn_kernel(%arg0: i32, %arg1: i32, %arg2: i32, %arg3: memref<2xi32, #tpu.memory_space<smem>>, %arg4: memref<2xi32, #tpu.memory_space<smem>>, %arg5: memref<1x1x16x8xbf16, #tpu.memory_space<vmem>>, %arg6: memref<1x1x16x8xbf16, #tpu.memory_space<vmem>>, %arg7: memref<1x1x16x128xbf16, #tpu.memory_space<vmem>>, %arg8: memref<1x1x16x128xbf16, #tpu.memory_space<vmem>>, %arg9: memref<16x128xf32, #tpu.memory_space<vmem>>) attributes {dimension_semantics = [#tpu.dimension_semantics<parallel>, #tpu.dimension_semantics<parallel>, #tpu.dimension_semantics<arbitrary>], iteration_bounds = array<i64: 2, 2, 2>, scalar_prefetch = 2 : i64, scratch_operands = 1 : i64, tpu.core_type = #tpu.core_type<tc>, window_params = [{transform_indices = @transform_0, window_bounds = array<i64: 1, 1, 16, 8>}, {transform_indices = @transform_1, window_bounds = array<i64: 1, 1, 16, 8>}, {transform_indices = @transform_2, window_bounds = array<i64: 1, 1, 16, 128>}, {transform_indices = @transform_3, window_bounds = array<i64: 1, 1, 16, 128>}]} {
    %0 = arith.index_cast %arg2 : i32 to index
    %1 = memref.load %arg3[%0] : memref<2xi32, #tpu.memory_space<smem>>
    %2 = arith.index_cast %arg2 : i32 to index
    %3 = memref.load %arg4[%2] : memref<2xi32, #tpu.memory_space<smem>>
    %c1_i32 = arith.constant 1 : i32
    %4 = arith.addi %c1_i32, %1 : i32
    %5 = arith.cmpi eq, %3, %4 : i32
    %c0_i32 = arith.constant 0 : i32
    %6 = arith.cmpi eq, %3, %c0_i32 : i32
    %7 = arith.extui %6 : i1 to i32
    %c0_i32_0 = arith.constant 0 : i32
    %8 = arith.cmpi ne, %7, %c0_i32_0 : i32
    scf.if %8 {
      %cst_17 = arith.constant 0.000000e+00 : f32
      %28 = vector.broadcast %cst_17 : f32 to vector<16x128xf32>
      %c0_18 = arith.constant 0 : index
      %c0_19 = arith.constant 0 : index
      %29 = vector.load %arg9[%c0_18, %c0_19] : memref<16x128xf32, #tpu.memory_space<vmem>>, vector<16x128xf32>
      tpu.vector_store %arg9[%c0_18, %c0_19], %28 {strides = array<i32>} : memref<16x128xf32, #tpu.memory_space<vmem>>, vector<16x128xf32>,
    } else {
    }
    %c0 = arith.constant 0 : index
    %c0_1 = arith.constant 0 : index
    %c0_2 = arith.constant 0 : index
    %c0_3 = arith.constant 0 : index
    %9 = vector.load %arg5[%c0, %c0_1, %c0_2, %c0_3] : memref<1x1x16x8xbf16, #tpu.memory_space<vmem>>, vector<1x1x16x8xbf16>
    %10 = vector.shape_cast %9 : vector<1x1x16x8xbf16> to vector<16x8xbf16>
    %c0_4 = arith.constant 0 : index
    %c0_5 = arith.constant 0 : index
    %c0_6 = arith.constant 0 : index
    %c0_7 = arith.constant 0 : index
    %11 = vector.load %arg6[%c0_4, %c0_5, %c0_6, %c0_7] : memref<1x1x16x8xbf16, #tpu.memory_space<vmem>>, vector<1x1x16x8xbf16>
    %12 = vector.shape_cast %11 : vector<1x1x16x8xbf16> to vector<16x8xbf16>
    %c0_8 = arith.constant 0 : index
    %c0_9 = arith.constant 0 : index
    %c0_10 = arith.constant 0 : index
    %c0_11 = arith.constant 0 : index
    %13 = vector.load %arg7[%c0_8, %c0_9, %c0_10, %c0_11] : memref<1x1x16x128xbf16, #tpu.memory_space<vmem>>, vector<1x1x16x128xbf16>
    %14 = vector.shape_cast %13 : vector<1x1x16x128xbf16> to vector<16x128xbf16>
    %cst = arith.constant dense<0.000000e+00> : vector<16x16xf32>
    %15 = tpu.matmul %10, %12, %cst {dimension_numbers = #tpu.dot_dimension_numbers<[1], [1], [0], [0], [0, 0, 1, 0], [], []>} : vector<16x8xbf16>, vector<16x8xbf16>, vector<16x16xf32> -> vector<16x16xf32>
    %cst_12 = arith.constant 6.250000e-02 : f32
    %16 = vector.broadcast %cst_12 : f32 to vector<16x16xf32>
    %17 = arith.mulf %15, %16 : vector<16x16xf32>
    %cst_13 = arith.constant 0.353553385 : f32
    %18 = vector.broadcast %cst_13 : f32 to vector<16x16xf32>
    %19 = arith.addf %18, %17 : vector<16x16xf32>
    %20 = arith.mulf %15, %19 : vector<16x16xf32>
    %cst_14 = arith.constant 1.000000e+00 : f32
    %21 = vector.broadcast %cst_14 : f32 to vector<16x16xf32>
    %22 = arith.addf %21, %20 : vector<16x16xf32>
    %true = arith.constant true
    %23 = arith.xori %5, %true : i1
    %24 = arith.extui %23 : i1 to i32
    %c0_i32_15 = arith.constant 0 : i32
    %25 = arith.cmpi ne, %24, %c0_i32_15 : i32
    scf.if %25 {
      %c0_17 = arith.constant 0 : index
      %c0_18 = arith.constant 0 : index
      %28 = vector.load %arg9[%c0_17, %c0_18] : memref<16x128xf32, #tpu.memory_space<vmem>>, vector<16x128xf32>
      %29 = arith.truncf %22 : vector<16x16xf32> to vector<16x16xbf16>
      %cst_19 = arith.constant dense<0.000000e+00> : vector<16x128xf32>
      %30 = tpu.matmul %29, %14, %cst_19 {dimension_numbers = #tpu.dot_dimension_numbers<[1], [0], [0], [1], [0, 0, 1, 1], [], []>} : vector<16x16xbf16>, vector<16x128xbf16>, vector<16x128xf32> -> vector<16x128xf32>
      %31 = arith.addf %28, %30 : vector<16x128xf32>
      %c0_20 = arith.constant 0 : index
      %c0_21 = arith.constant 0 : index
      %32 = vector.load %arg9[%c0_20, %c0_21] : memref<16x128xf32, #tpu.memory_space<vmem>>, vector<16x128xf32>
      tpu.vector_store %arg9[%c0_20, %c0_21], %31 {strides = array<i32>} : memref<16x128xf32, #tpu.memory_space<vmem>>, vector<16x128xf32>,
    } else {
    }
    %26 = arith.extui %5 : i1 to i32
    %c0_i32_16 = arith.constant 0 : i32
    %27 = arith.cmpi ne, %26, %c0_i32_16 : i32
    scf.if %27 {
      %28 = tpu.iota {dimensions = array<i32: 0>} : vector<16x16xi32>
      %29 = tpu.iota {dimensions = array<i32: 1>} : vector<16x16xi32>
      %30 = arith.cmpi sle, %29, %28 : vector<16x16xi32>
      %cst_17 = arith.constant 0.000000e+00 : f32
      %31 = vector.broadcast %cst_17 : f32 to vector<16x16xf32>
      %32 = arith.select %30, %22, %31 : vector<16x16xi1>, vector<16x16xf32>
      %c0_18 = arith.constant 0 : index
      %c0_19 = arith.constant 0 : index
      %33 = vector.load %arg9[%c0_18, %c0_19] : memref<16x128xf32, #tpu.memory_space<vmem>>, vector<16x128xf32>
      %34 = arith.truncf %32 : vector<16x16xf32> to vector<16x16xbf16>
      %cst_20 = arith.constant dense<0.000000e+00> : vector<16x128xf32>
      %35 = tpu.matmul %34, %14, %cst_20 {dimension_numbers = #tpu.dot_dimension_numbers<[1], [0], [0], [1], [0, 0, 1, 1], [], []>} : vector<16x16xbf16>, vector<16x128xbf16>, vector<16x128xf32> -> vector<16x128xf32>
      %36 = arith.addf %33, %35 : vector<16x128xf32>
      %37 = vector.extract_strided_slice %36 {offsets = [0, 16], sizes = [16, 1], strides = [1, 1]} : vector<16x128xf32> to vector<16x1xf32>
      %cst_21 = arith.constant 9.99999996E-13 : f32
      %38 = vector.broadcast %cst_21 : f32 to vector<16x1xf32>
      %39 = arith.addf %37, %38 : vector<16x1xf32>
      %40 = tpu.reciprocal %39 {approx = true} : vector<16x1xf32> -> vector<16x1xf32>
      %41 = vector.broadcast %40 : vector<16x1xf32> to vector<16x128xf32>
      %42 = arith.mulf %36, %41 : vector<16x128xf32>
      %43 = arith.truncf %42 : vector<16x128xf32> to vector<16x128xbf16>
      %c0_22 = arith.constant 0 : index
      %c0_23 = arith.constant 0 : index
      %c0_24 = arith.constant 0 : index
      %c0_25 = arith.constant 0 : index
      %44 = vector.load %arg8[%c0_22, %c0_23, %c0_24, %c0_25] : memref<1x1x16x128xbf16, #tpu.memory_space<vmem>>, vector<1x1x16x128xbf16>
      %45 = vector.shape_cast %44 : vector<1x1x16x128xbf16> to vector<16x128xbf16>
      %46 = vector.shape_cast %43 : vector<16x128xbf16> to vector<1x1x16x128xbf16>
      tpu.vector_store %arg8[%c0_22, %c0_23, %c0_24, %c0_25], %46 {strides = array<i32>} : memref<1x1x16x128xbf16, #tpu.memory_space<vmem>>, vector<1x1x16x128xbf16>,
    } else {
    }
    return
  }
  func.func @transform_0(%arg0: i32, %arg1: i32, %arg2: i32, %arg3: memref<2xi32, #tpu.memory_space<smem>>, %arg4: memref<2xi32, #tpu.memory_space<smem>>) -> (i32, i32, i32, i32) {
    %0 = arith.index_cast %arg2 : i32 to index
    %1 = memref.load %arg3[%0] : memref<2xi32, #tpu.memory_space<smem>>
    %c0_i32 = arith.constant 0 : i32
    %c0_i32_0 = arith.constant 0 : i32
    return %arg0, %arg1, %1, %c0_i32 : i32, i32, i32, i32
  }
  func.func @transform_1(%arg0: i32, %arg1: i32, %arg2: i32, %arg3: memref<2xi32, #tpu.memory_space<smem>>, %arg4: memref<2xi32, #tpu.memory_space<smem>>) -> (i32, i32, i32, i32) {
    %0 = arith.index_cast %arg2 : i32 to index
    %1 = memref.load %arg4[%0] : memref<2xi32, #tpu.memory_space<smem>>
    %c0_i32 = arith.constant 0 : i32
    %c0_i32_0 = arith.constant 0 : i32
    return %arg0, %arg1, %1, %c0_i32 : i32, i32, i32, i32
  }
  func.func @transform_2(%arg0: i32, %arg1: i32, %arg2: i32, %arg3: memref<2xi32, #tpu.memory_space<smem>>, %arg4: memref<2xi32, #tpu.memory_space<smem>>) -> (i32, i32, i32, i32) {
    %0 = arith.index_cast %arg2 : i32 to index
    %1 = memref.load %arg4[%0] : memref<2xi32, #tpu.memory_space<smem>>
    %c0_i32 = arith.constant 0 : i32
    %c0_i32_0 = arith.constant 0 : i32
    return %arg0, %arg1, %1, %c0_i32 : i32, i32, i32, i32
  }
  func.func @transform_3(%arg0: i32, %arg1: i32, %arg2: i32, %arg3: memref<2xi32, #tpu.memory_space<smem>>, %arg4: memref<2xi32, #tpu.memory_space<smem>>) -> (i32, i32, i32, i32) {
    %0 = arith.index_cast %arg2 : i32 to index
    %1 = memref.load %arg3[%0] : memref<2xi32, #tpu.memory_space<smem>>
    %c0_i32 = arith.constant 0 : i32
    %c0_i32_0 = arith.constant 0 : i32
    return %arg0, %arg1, %1, %c0_i32 : i32, i32, i32, i32
  }
}

</mosaic_0001>

<bundles_post_ra>
// kernel: tpu_custom_call.1
= control target key start
LH: loop header
LB: loop body
LE: loop exit
PB: predicated region body
PF: predicated region fallthrough
CT: control target
= control target key end

     0   :  { %s1329_s0 = inlined_call_operand.vmem [shape: s32[2], index: 0, kind: input, shape index: {}]   ;;  %s1330_s2 = inlined_call_operand.vmem [shape: bf16[2,2,16,8], index: 2, kind: input, shape index: {}]   ;;  %s1331_s3 = inlined_call_operand.vmem [shape: bf16[2,2,32,8], index: 3, kind: input, shape index: {}]   ;;  %s1332_s4 = inlined_call_operand.vmem [shape: bf16[2,2,32,128], index: 4, kind: input, shape index: {}]   ;;  %s1333_s5 = inlined_call_operand.hbm [shape: bf16[2,2,16,128], index: 5, kind: output, shape index: {}]   ;;  %s1334_s1 = inlined_call_operand.vmem [shape: s32[2], index: 1, kind: input, shape index: {}]  }
   0x1   :  { %1349 = sst [smem:[#allocation23_spill]] %s1333_s5  ;;  %s10_s20 = sshll.u32 %s1329_s0, 4  ;;  %s11_s20 = int_to_ptr.vmem [resolvable:$true] %s10_s20 }
   0x2   :  { %s14_s23 = sshll.u32 %s1334_s1, 4  ;;  %s937_s24 = scalar_lea.vmem %s11_s20, 16  ;;  %s15_s23 = int_to_ptr.vmem [resolvable:$true] %s14_s23 }
   0x3   :  { %p938_p0 = scmp.ne.s32.totalorder %s11_s20, %s937_s24  ;;  %p942_p1 = scmp.lt.s32.totalorder %s11_s20, %s11_s20 }
   0x4   :  { %p943_p2 = scmp.lt.s32.totalorder %s937_s24, %s937_s24 }
   0x6   :  { %p944_p3 = por %p943_p2, %p942_p1 }
   0x8   :  { %p945_p4 = pnand %p944_p3, %p938_p0 }
   0xa   :  { %948 = shalt.err (!%p945_p4)  }
   0xb   :  { %s1073_s25 = smov [#allocation4]   ;;  %s949_s26 = scalar_lea.vmem %s15_s23, 16 }
   0xc   :  { %13 = dma.vmem_to_smem %s11_s20, 16, %s1073_s25, [#allocation3] }
   0xd   :  { %p950_p5 = scmp.ne.s32.totalorder %s15_s23, %s949_s26  ;;  %p954_p6 = scmp.lt.s32.totalorder %s15_s23, %s15_s23 }
   0xe   :  { %p955_p7 = scmp.lt.s32.totalorder %s949_s26, %s949_s26 }
  0x10   :  { %p956_p8 = por %p955_p7, %p954_p6 }
  0x12   :  { %p957_p9 = pnand %p956_p8, %p950_p5 }
  0x14   :  { %960 = shalt.err (!%p957_p9)  }
  0x15   :  { %s1074_s0 = smov [#allocation5]  }
  0x16   :  { %17 = dma.vmem_to_smem %s15_s23, 16, %s1074_s0, [#allocation3] }
  0x17   :  { %1027 = dma.done.wait [#allocation3], 32 }
  0x18   :  { %1028 = vsyncadd [#allocation3], 4294967264 }
  0x19   :  { %19 = sfence }
  0x1a   :  { %20 = vsyncpa [#allocation7], 0 }
  0x1b   :  { %22 = vsyncpa [#allocation7 + $0x1], 0  ;;  %s1122_s1 = smov 0   ;;  %s1124_s27 = smov 0  }
  0x1c   :  { %s1126_s28 = smov 0   ;;  %s1128_s29 = smov 0  }
  0x1d   :  { %s1130_s30 = smov 0   ;;  %s1132_s6 = smov 0  }
  0x1e   :  { %s1134_s7 = smov 0   ;;  %s1136_s8 = smov 0  }
  0x1f   :  { %s1138_s9 = smov 0   ;;  %s1140_s10 = smov 0  }
  0x20 LB: > { %1350 = sst [smem:[#allocation11_spill]] %s1035_s1  ;;  %s761_s11 = sadd.s32 4294967295, %s1071_s10   ;;  %s1071_s10 = sphi %s1140_s10, %s28_s10   ;;  %s1067_s9 = sphi %s1138_s9, %s1378_s9   ;;  %s1063_s8 = sphi %s1136_s8, %s1377_s8   ;;  %s1059_s7 = sphi %s1134_s7, %s1376_s7   ;;  %s1055_s6 = sphi %s1132_s6, %s1375_s6   ;;  %s1051_s30 = sphi %s1130_s30, %s1374_s30   ;;  %s1047_s29 = sphi %s1128_s29, %s1373_s29   ;;  %s1043_s28 = sphi %s1126_s28, %s1372_s28   ;;  %s1039_s27 = sphi %s1124_s27, %s1371_s27   ;;  %s1035_s1 = sphi %s1122_s1, %s1370_s1  }
  0x21   : > { %1351 = sst [smem:[#allocation12_spill]] %s1039_s27  ;;  %s762_s12 = sadd.s32 4294967294, %s1071_s10  }
  0x22   : > { %1352 = sst [smem:[#allocation13_spill]] %s1043_s28  ;;  %s40_s13 = sadd.s32 1, %s1059_s7 }
  0x23   : > { %1353 = sst [smem:[#allocation14_spill]] %s1059_s7  ;;  %p41_p10 = scmp.ge.s32.totalorder %s40_s13, 2 }
  0x24   : > { %1354 = sst [smem:[#allocation15_spill]] %s1063_s8  ;;  %s43_s14 = sadd.s32 1, %s1063_s8 }
  0x25   : > { %1355 = sst [smem:[#allocation16_spill]] %s1067_s9  ;;  %s47_s15 = sadd.s32 1, %s1067_s9 }
  0x26   : > { %1356 = sst [smem:[#allocation17_spill]] %s1071_s10  ;;  %s1380_s13 = smov (%p41_p10, %s40_s13), 0 }
  0x27   : > { %s147_s16 = sld [smem:[#allocation4 + %s1059_s7]]  ;;  %s1382_s14 = smov (!%p41_p10, %s43_s14), %s1063_s8 }
  0x28   : > { %1357 = sst [smem:[#allocation18_spill]] %s1380_s13  ;;  %p166_p11 = scmp.ne.s32.totalorder %s1043_s28, %s1039_s27 }
  0x29   : > { %s148_s17 = sld [smem:[#allocation4 + %s1380_s13]]  ;;  %p45_p12 = scmp.ge.s32.totalorder %s1382_s14, 2 }
  0x2a   : > { %p167_p13 = scmp.eq.s32.totalorder %s761_s11, 7  ;;  %p172_p0 = scmp.ne.s32.totalorder %s1039_s27, %s1035_s1 }
  0x2b   : > { %p173_p1 = scmp.eq.s32.totalorder %s762_s12, 7  ;;  %s1384_s14 = smov (%p45_p12, %s1382_s14), 0 }
  0x2c   : > { %1358 = sst [smem:[#allocation19_spill]] %s1384_s14  ;;  %s1386_s15 = smov (!%p45_p12, %s47_s15), %s1067_s9 }
  0x2d   : > { %p1189_p2 = por %p167_p13, %p166_p11  ;;  %p49_p3 = scmp.ge.s32.totalorder %s1386_s15, 2 }
  0x2e   : > { %s150_s19 = ssub.s32 %s1063_s8, %s1384_s14  ;;  %p1195_p4 = por %p173_p1, %p172_p0 }
  0x2f   : > { %p765_p5 = scmp.ge.s32.totalorder %s1071_s10, 1  ;;  %s1388_s15 = smov (%p49_p3, %s1386_s15), 0 }
  0x30   : > { %s1360_s20 = scalar_select %p1195_p4, 1, 0 }
  0x31   : > { %1362 = sst [smem:[#allocation21_spill]] %s1388_s15  ;;  %s152_s21 = ssub.s32 %s147_s16, %s148_s17 }
  0x32   : > { %1361 = sst [smem:[#allocation20_spill]] %s1360_s20  ;;  %p248_p6 = scmp.lt.s32.totalorder %s1071_s10, 9 }
  0x33   : > { %s149_s22 = ssub.s32 %s1067_s9, %s1388_s15  ;;  %s156_s25 = sadd.s32 1, %s1043_s28 }
  0x34   : > { %s151_s23 = sor.u32 %s150_s19, %s149_s22  ;;  %p249_p7 = pnand %p765_p5, %p248_p6 }
  0x35   : > { %s153_s24 = sor.u32 %s152_s21, %s151_s23  ;;  %s1337_s0 = sand.u32 (!%p249_p7), 1, %s1039_s27  }
  0x36   : > { %p154_p8 = scmp.eq.s32.totalorder %s153_s24, 0  ;;  %252 = sbr.rel (%p249_p7) target bundleno = 891 (0x37b), region = 32 }
  0x37   : > { %s309_s11 = sld [smem:[#allocation4 + %s1047_s29]] (!%p249_p7)  ;;  %s1213_s12 = sshll.u32 (!%p249_p7), %s1337_s0, 3 }
  0x38   : > { %s1207_s26 = scalar_select %p154_p8, %s1043_s28, %s156_s25  }
  0x39   : > { %p311_p9 = scmp.lt.s32.totalorder (!%p249_p7), %s1055_s6, 1  ;;  %p313_p10 = scmp.lt.s32.totalorder (!%p249_p7), %s1051_s30, 1 }
  0x3a   : > { %1363 = sst [smem:[#allocation22_spill]] %s1207_s26  ;;  %s308_s26 = scalar_lea.vmem (!%p249_p7), [#allocation6], %s1213_s12 }
  0x3b   : > { %s1218_s16 = scalar_select %p311_p9, %s1055_s6, 1 }
  0x3c   : > { %s314_s17 = scalar_select %p313_p10, %s1051_s30, 1 }
  0x3d   : > { %s325_s19 = sld [smem:[#allocation5 + %s1047_s29]]  ;;  %s767_s21 = sshll.u32 %s309_s11, 1 }
  0x3e   : > { %s769_s22 = sshll.u32 %s1218_s16, 2  ;;  %p315_p11 = scmp.lt.s32.totalorder %s767_s21, 1 }
  0x3f   : > { %s768_s23 = sshll.u32 %s314_s17, 1  ;;  %s772_s24 = sshll.u32 %s314_s17, 2 }
  0x40   : > { %s341_s25 = sld [smem:[#allocation5 + %s1047_s29]]  ;;  %s1390_s21 = smov (!%p315_p11, %s767_s21), 1 }
  0x41   : > { %s773_s15 = sshll.u32 %s1218_s16, 3  ;;  %s1226_s14 = sld [smem:[#allocation4 + %s1047_s29]] }
  0x42   : > { %s318_s0 = sadd.s32 %s768_s23, %s1390_s21  ;;  %s1229_s7 = sld [smem:[#allocation5 + %s1047_s29]] }
  0x43   : > { %s771_s13 = sshll.u32 %s325_s19, 1  ;;  %s320_s9 = sadd.s32 %s769_s22, %s318_s0 }
  0x44   : > { %p331_p12 = scmp.lt.s32.totalorder %s771_s13, 3  ;;  %s770_s8 = sshll.u32 %s320_s9, 2 }
  0x45   : > { %s1234_s28 = scalar_lea.vmem %s1330_s2, %s770_s8 }
  0x46   : > { %s775_s17 = sshll.u32 %s341_s25, 1  ;;  %s1392_s13 = smov (!%p331_p12, %s771_s13), 3 }
  0x47   : > { %s362_s20 = sadd.s32 1, %s1226_s14  ;;  %s334_s16 = sadd.s32 %s772_s24, %s1392_s13 }
  0x48   : > { %p347_p13 = scmp.lt.s32.totalorder %s775_s17, 3  ;;  %s336_s1 = sadd.s32 %s773_s15, %s334_s16 }
  0x49   : > { %s774_s10 = sshll.u32 %s336_s1, 2  ;;  %p779_p0 = scmp.ne.s32.totalorder %s1229_s7, 0 }
  0x4a   : > { %s338_s0 = scalar_lea.vmem %s1331_s3, %s774_s10  ;;  %s1394_s17 = smov (!%p347_p13, %s775_s17), 3 }
  0x4b   : > { %s350_s9 = sadd.s32 %s772_s24, %s1394_s17  ;;  %367 = sbr.rel (%p779_p0) target bundleno = 82 (0x52), region = 36 }
  0x4c   : > { %s352_s22 = sadd.s32 %s773_s15, %s350_s9 }
  0x4d   : > { %s778_s23 = sshll.u32 %s352_s22, 2 }
  0x4e   : > { %s354_s8 = scalar_lea.vmem %s1332_s4, %s778_s23 }
  0x50   : > { %v1075_v0 = vmov 0.0  }
  0x51   : > { %368 = vst [vmem:[#allocation2] sm:$0xff] %v1075_v0  ;;  %369 = vst [vmem:[#allocation2 + $0x8] sm:$0xff] %v1075_v0 }
  0x52 PF: > { %v374_v1 = vld [vmem:[%s354_s8] sm:$0xf]  ;;  %v375_v2 = vld [vmem:[%s354_s8 + $0x4] sm:$0xf]  ;;  %v1076_v4 = vmov 0.0   ;;  %vm386_vm0 = vcmask 64512   ;;  %p783_p1 = scmp.eq.s32.totalorder %s1229_s7, %s362_s20 }
  0x53   : > { %v930_v3 = vld [vmem:[%s338_s0] sm:$0xff]   ;;  %811 = vmatprep.subr.bf16.mxu0 %v1076_v4  ;;  %vm1077_vm1 = vmmov 0  }
  0x54   : > { %v391_v5 = vsel %vm386_vm0, %v930_v3, 0  ;;  %813 = vmatprep.mubr.msk.bf16.mxu0 %vm1077_vm1, %v1076_v4  ;;  %v931_v6 = vld [vmem:[%s1234_s28] sm:$0xff]  }
  0x55   : > { %812 = vmatpush3.bf16.xpose.msra.mxu0 %v391_v5 }
  0x5c   : > { %814 = vmatmul.mubr.msk.bf16.vlgmr.msra.gmra.mxu0 %vm386_vm0, %v931_v6 }
 0x11c   : > { %v427_v7 = vpop.f32.mrf.mxu0 }
 0x11d   : > { %v434_v8 = vmul.f32 0.0625, %v427_v7 }
 0x11e   : > { %v815_v9 = vpop.f32.mrf.mxu0 }
 0x11f   : > { %v436_v10 = vadd.f32 0.35355338, %v434_v8 }
 0x120   : > { %v430_v11 = vpop.f32.mrf.mxu0 }
 0x121   : > { %v438_v12 = vmul.f32 %v436_v10, %v427_v7  ;;  %v435_v13 = vmul.f32 0.0625, %v430_v11 }
 0x122   : > { %v816_v14 = vpop.f32.mrf.mxu0 }
 0x123   : > { %v440_v15 = vadd.f32 1.0, %v438_v12  ;;  %v437_v16 = vadd.f32 0.35355338, %v435_v13  ;;  %445 = sbr.rel (%p783_p1) target bundleno = 501 (0x1f5), region = 40 }
 0x125   : > { %v439_v17 = vmul.f32 %v437_v16, %v430_v11 }
 0x127   : > { %v441_v18 = vadd.f32 1.0, %v439_v17 }
 0x128   : > { %v784_v19 = vcombine.low %v374_v1, %v375_v2  ;;  %v1078_v20 = vmov 0.0   ;;  %vm1079_vm2 = vmmov 0   ;;  %vm455_vm3 = vcmask 130048   ;;  %v446_v22 = vld [vmem:[#allocation2] sm:$0xff]  ;;  %v447_v26 = vld [vmem:[#allocation2 + $0x8] sm:$0xff] }
 0x129   : > { %817 = vmatprep.subr.bf16.mxu0 %v1078_v20  ;;  %819 = vmatprep.mubr.msk.bf16.mxu0 %vm1079_vm2, %v1078_v20  ;;  %v448_v21 = vpack.c.bf16 %v441_v18, %v440_v15 }
 0x12a   : > { %818 = vmatpush3.bf16.msra.mxu0 %v784_v19 }
 0x12d   : > { %820 = vmatmul.mubr.msk.bf16.vlgmr.msra.gmra.mxu0 %vm455_vm3, %v448_v21 }
 0x1ed   : > { %v493_v23 = vpop.f32.mrf.mxu0 }
 0x1ee   : > { %v500_v24 = vadd.f32 %v493_v23, %v446_v22 }
 0x1ef   : > { %v821_v25 = vpop.f32.mrf.mxu0 }
 0x1f0   : > { %502 = vst [vmem:[#allocation2] sm:$0xff] %v500_v24 }
 0x1f1   : > { %v496_v27 = vpop.f32.mrf.mxu0 }
 0x1f2   : > { %v501_v28 = vadd.f32 %v496_v27, %v447_v26 }
 0x1f3   : > { %v822_v29 = vpop.f32.mrf.mxu0 }
 0x1f4   : > { %503 = vst [vmem:[#allocation2 + $0x8] sm:$0xff] %v501_v28 }
 0x1f5 PF: > { %p786_p3 = scmp.ne.s32.totalorder %s1229_s7, %s362_s20 }
 0x1f7   : > { %506 = sbr.rel (%p786_p3) target bundleno = 862 (0x35e), region = 44 }
 0x1fc   : > { %v787_v30 = vcombine.low %v374_v1, %v375_v2  ;;  %v507_v31 = vlaneseq  ;;  %v1080_v32 = vmov 0.0   ;;  %vm1081_vm4 = vmmov 0   ;;  %v516_v40 = vld [vmem:[#allocation2] sm:$0xff]  ;;  %v517_v44 = vld [vmem:[#allocation2 + $0x8] sm:$0xff] }
 0x1fd   : > { %823 = vmatprep.subr.bf16.mxu0 %v1080_v32  ;;  %825 = vmatprep.mubr.msk.bf16.mxu0 %vm1081_vm4, %v1080_v32  ;;  %vm525_vm7 = vcmask 130048   ;;  %v1082_v39 = vmov 16  }
 0x1fe   : > { %824 = vmatpush3.bf16.msra.mxu0 %v787_v30  ;;  %v508_v33 = vshrl.u32 %v507_v31, 7  ;;  %v511_v34 = vand.u32 127, %v507_v31  ;;  %932 = vset.pattern.permute.xlu0 %v1082_v39 }
 0x200   : > { %v509_v35 = vadd.s32 8, %v508_v33  ;;  %vm512_vm5 = vcmp.le.s32.totalorder %v511_v34, %v508_v33 }
 0x201   : > { %v514_v36 = vsel %vm512_vm5, %v440_v15, 0.0 }
 0x202   : > { %vm513_vm6 = vcmp.le.s32.totalorder %v511_v34, %v509_v35 }
 0x203   : > { %v515_v37 = vsel %vm513_vm6, %v441_v18, 0.0 }
 0x204   : > { %v518_v38 = vpack.c.bf16 %v515_v37, %v514_v36 }
 0x206   : > { %826 = vmatmul.mubr.msk.bf16.vlgmr.msra.gmra.mxu0 %vm525_vm7, %v518_v38 }
 0x2c6   : > { %v563_v41 = vpop.f32.mrf.mxu0 }
 0x2c7   : > { %v570_v42 = vadd.f32 %v563_v41, %v516_v40 }
 0x2c8   : > { %v827_v43 = vpop.f32.mrf.mxu0 }
 0x2c9   : > { %v572_v45 = vadd.f32 1e-12, %v570_v42 }
 0x2ca   : > { %v566_v46 = vpop.f32.mrf.mxu0 }
 0x2cb   : > { %933 = vrcp.f32 %v572_v45  ;;  %v571_v47 = vadd.f32 %v566_v46, %v517_v44 }
 0x2cc   : > { %v828_v48 = vpop.f32.mrf.mxu0 }
 0x2cd   : > { %v573_v49 = vadd.f32 1e-12, %v571_v47 }
 0x2cf   : > { %935 = vrcp.f32 %v573_v49 }
 0x2d8   : > { %v934_v50 = vpop.eup %933 }
 0x2d9   : > { %578 = vperm.xlu0 %932, %v934_v50  }
 0x2dc   : > { %v936_v51 = vpop.eup %935 }
 0x2dd   : > { %583 = vperm.xlu0 %932, %v936_v51  }
 0x354   : > { %v579_v52 = vpop.permute.xlu0 %578 }
 0x355   : > { %v586_v54 = vmul.f32 %v579_v52, %v570_v42 }
 0x358   : > { %v584_v53 = vpop.permute.xlu0 %583 }
 0x359   : > { %v587_v55 = vmul.f32 %v584_v53, %v571_v47 }
 0x35b   : > { %v803_v56 = vpack.c.bf16 %v587_v55, %v586_v54 }
 0x35d   : > { %804 = vst [vmem:[%s308_s26] sm:$0xff] %v803_v56  }
 0x35e PF: > { %s1364_s5 = sld [smem:[#allocation12_spill]]  ;;  %s1396_s29 = smov (!%p1189_p2, %s1047_s29), 0 }
 0x35f   : > { %s829_s1 = scalar_select %p1189_p2, [#allocation4], [#allocation8] }
 0x360   : > { %s617_s28 = sshll.u32 %s308_s26, 4  ;;  %s793_s7 = sshll.u32 %s1051_s30, 1  ;;  %s1263_s28 = int_to_ptr.vmem [resolvable:$true] %s617_s28 }
 0x361   : > { %s606_s27 = sld [smem:[%s829_s1 + %s1396_s29]]  ;;  %s794_s10 = sshll.u32 %s1055_s6, 2 }
 0x362   : > { %s1365_s11 = sld [smem:[#allocation23_spill]]  ;;  %s961_s12 = scalar_lea.vmem %s1263_s28, 128 }
 0x363   : > { %p962_p5 = scmp.ne.s32.totalorder %s1263_s28, %s961_s12  ;;  %s1083_s30 = smov [#allocation6]  }
 0x364   : > { %s1366_s16 = sand.u32 1, %s1364_s5   ;;  %s965_s6 = sshll.u32 %s1083_s30, 4  ;;  %s966_s6 = int_to_ptr.vmem [resolvable:$false] %s965_s6 }
 0x365   : > { %s1272_s29 = scalar_lea.sflag [#allocation7], %s1366_s16  ;;  %p963_p6 = pnand %p962_p5, %p1189_p2 }
 0x366   : > { %s967_s21 = scalar_lea.vmem %s966_s6, 256  ;;  %p968_p8 = scmp.lt.s32.totalorder %s1263_s28, %s966_s6 }
 0x367   : > { %s792_s13 = sshll.u32 %s606_s27, 1  ;;  %p964_p7 = pneg %p963_p6 }
 0x368   : > { %s612_s14 = sadd.s32 %s793_s7, %s792_s13  ;;  %p969_p9 = scmp.lt.s32.totalorder %s967_s21, %s961_s12 }
 0x369   : > { %s614_s15 = sadd.s32 %s794_s10, %s612_s14 }
 0x36a   : > { %s795_s20 = sshll.u32 %s614_s15, 6  ;;  %p970_p10 = por %p969_p9, %p968_p8 }
 0x36b   : > { %s1268_s17 = scalar_lea.hbm %s1365_s11, %s795_s20 }
 0x36c   : > { %p971_p11 = pnand %p970_p10, %p964_p7 }
 0x36e   : > { %974 = shalt.err (!%p971_p11)
}
 0x36f   : > { %s975_s19 = scalar_lea.hbm %s1268_s17, 128  ;;  %s979_s22 = scalar_lea.hbm %s1365_s11, 512 }
 0x370   : > { %p976_p12 = scmp.ne.s32.totalorder %s1268_s17, %s975_s19  ;;  %p980_p1 = scmp.lt.s32.totalorder %s1268_s17, %s1365_s11 }
 0x371   : > { %p981_p3 = scmp.lt.s32.totalorder %s979_s22, %s975_s19 }
 0x372   : > { %p977_p13 = pnand %p976_p12, %p1189_p2 }
 0x373   : > { %p982_p5 = por %p981_p3, %p980_p1 }
 0x374   : > { %p978_p0 = pneg %p977_p13 }
 0x376   : > { %p983_p6 = pnand %p982_p5, %p978_p0 }
 0x378   : > { %986 = shalt.err (!%p983_p6)
}
 0x379   : > { %s1084_s26 = smov 64   ;;  %s1085_s5 = smov 4  }
 0x37a   : > { %831 = dma.vmem_to_hbm [thread:$0]  (%p1189_p2), %s1263_s28, 128, %s1268_s17, %s1272_s29, %s1084_s26, %s1084_s26, %s1085_s5  }
 0x37b PF: > { %s1367_s1 = sld [smem:[#allocation17_spill]] }
 0x37c   : > { %s1368_s27 = sld [smem:[#allocation11_spill]] }
 0x381   : > { %p837_p7 = scmp.ge.s32.totalorder %s1367_s1, 2 }
 0x382   : > { %s632_s10 = sand.u32 1, %s1368_s27  }
 0x383   : > { %p834_p8 = pnand %p837_p7, %p1195_p4  ;;  %s633_s13 = scalar_lea.sflag [#allocation7], %s632_s10 }
 0x385   : > { %p835_p9 = pneg %p834_p8 }
 0x387   : > { %1030 = dma.done.wait (%p835_p9), %s633_s13, 128  }
 0x388   : > { %1032 = vsyncadd (%p835_p9), %s633_s13, 4294967168  ;;  %s28_s10 = sadd.s32 1, %s1367_s1   ;;  %s1370_s1 = sld [smem:[#allocation12_spill]] }
 0x389   : > { %p25_p10 = scmp.ge.s32.totalorder %s28_s10, 10   ;;  %s1371_s27 = sld [smem:[#allocation13_spill]] }
 0x38a   : > { %s1372_s28 = sld [smem:[#allocation22_spill]] }
 0x38b   : > { %s1373_s29 = sld [smem:[#allocation14_spill]] }
 0x38c   : > { %s1374_s30 = sld [smem:[#allocation15_spill]]  ;;  %27 = sbr.rel (!%p25_p10) target bundleno = 32 (0x20), region = 85 }
 0x38d   : > { %s1375_s6 = sld [smem:[#allocation16_spill]] }
 0x38e   : > { %s1376_s7 = sld [smem:[#allocation18_spill]] }
 0x38f   : > { %s1377_s8 = sld [smem:[#allocation19_spill]] }
 0x390   : > { %s1378_s9 = sld [smem:[#allocation21_spill]] }
 0x391   :  { %638 = vsyncpa [#allocation7], 1 }
 0x392   :  { %640 = vsyncpa [#allocation7 + $0x1], 1 }

</bundles_post_ra>
